<compile_context>
chip_gen: v7x
topology: tpu7x:2x2x1
jax: 0.10.0
libtpu: 0.0.40
codegen_flags: <defaults>
</compile_context>

<pallas_src>
import jax
import jax.numpy as jnp
from jax.experimental import pallas as pl
from jax.experimental.pallas import tpu as pltpu


def _tcb_kernel(x_ref, we_ref, wg_ref, scale_ref, shift_ref, bg_ref, o_ref):
    # x_ref block: (1, snip, C, T) with T lane-dense (multiple of 128).
    snip = x_ref.shape[1]
    we = we_ref[...]                       # (C_out, C_in), native activation dtype
    wg = wg_ref[...]

    # embed_conv per snip slice, fused with the running max over snip.
    m = jnp.dot(we, x_ref[0, 0], preferred_element_type=jnp.float32)   # (C, T) f32
    for s in range(1, snip):
        y = jnp.dot(we, x_ref[0, s], preferred_element_type=jnp.float32)
        m = jnp.maximum(m, y)

    # eval-mode BatchNorm affine (embed bias folded into shift) + ReLU.
    r = jnp.maximum(m * scale_ref[...] + shift_ref[...], 0.0)          # (C, T) f32

    # global_conv (1x1 conv == channel-mixing matmul).
    g = jnp.dot(wg, r.astype(wg.dtype),
                preferred_element_type=jnp.float32) + bg_ref[...]      # (C, T) f32

    # Broadcast over snip and add the identity; lane-dense full-width stores.
    if o_ref.dtype == jnp.float32:
        for s in range(snip):
            o_ref[0, s] = x_ref[0, s] + g
    else:
        g_lo = g.astype(o_ref.dtype)       # downcast once, outside the loop
        for s in range(snip):
            o_ref[0, s] = x_ref[0, s] + g_lo


def _pick_hw_tile(hw_pad, snip, c, itemsize, budget_bytes, min_spatial_steps=1):
    """Largest lane-dense (x128) divisor of hw_pad whose x/out block fits the
    per-block byte budget, preferring tiles that leave at least
    `min_spatial_steps` grid steps along the spatial axis (so both v7x
    TensorCores get work even when the batch-group axis is 1)."""
    cands = sorted((t for t in range(128, hw_pad + 1, 128) if hw_pad % t == 0),
                   reverse=True)
    block_bytes = lambda t: snip * c * t * itemsize
    for t in cands:
        if block_bytes(t) <= budget_bytes and hw_pad // t >= min_spatial_steps:
            return t
    for t in cands:
        if block_bytes(t) <= budget_bytes:
            return t
    return 128  # smallest lane-dense tile (hw_pad is always a x128 multiple)


def temporal_context_block_max(x_nchw, snip, params,
                               vmem_limit_bytes=48 * 1024 * 1024):
    B_S, C, H, W = x_nchw.shape
    assert B_S % snip == 0
    B = B_S // snip
    HW = H * W
    dt = x_nchw.dtype

    # Pure reshape (contiguous).  Pad the spatial axis up to a multiple of 128
    # so the kernel's output stores are always full-width (lane-dense).
    HW_pad = ((HW + 127) // 128) * 128
    xk = x_nchw.reshape(B, snip, C, HW)
    if HW_pad != HW:
        xk = jnp.pad(xk, ((0, 0), (0, 0), (0, 0), (0, HW_pad - HW)))

    # Fold eval-mode BN and the embed bias:  BN(m + b_e) = m*scale + shift
    eps = 1e-5
    scale = params["bn_gamma"] / jnp.sqrt(params["bn_var"] + eps)
    shift = scale * (params["embed_b"] - params["bn_mean"]) + params["bn_beta"]

    we = params["embed_w"].astype(dt)                     # (C_out, C_in)
    wg = params["global_w"].astype(dt)
    scale_col = scale.reshape(C, 1).astype(jnp.float32)
    shift_col = shift.reshape(C, 1).astype(jnp.float32)
    bg_col = params["global_b"].reshape(C, 1).astype(jnp.float32)

    # Per-block byte budget: in + out blocks are double buffered (4x block)
    # plus ~3 f32 intermediates (m, r, g) of size C*T*4 -> keep the x block to
    # ~vmem_limit/12 so the total stays comfortably inside the scoped limit
    # (and inside v7x's 64 MiB physical VMEM).
    budget_bytes = max(vmem_limit_bytes // 12, 256 * 1024)
    min_spatial_steps = 2 if B < 2 else 1
    T = _pick_hw_tile(HW_pad, snip, C, xk.dtype.itemsize,
                      budget_bytes, min_spatial_steps)
    grid = (B, HW_pad // T)

    call = pl.pallas_call(
        _tcb_kernel,
        out_shape=jax.ShapeDtypeStruct((B, snip, C, HW_pad), dt),
        grid_spec=pltpu.PrefetchScalarGridSpec(
            num_scalar_prefetch=0,
            grid=grid,
            in_specs=[
                pl.BlockSpec((1, snip, C, T), lambda b, h: (b, 0, 0, h)),  # x
                pl.BlockSpec((C, C), lambda b, h: (0, 0)),                 # embed W
                pl.BlockSpec((C, C), lambda b, h: (0, 0)),                 # global W
                pl.BlockSpec((C, 1), lambda b, h: (0, 0)),                 # BN scale
                pl.BlockSpec((C, 1), lambda b, h: (0, 0)),                 # BN shift (+ embed bias)
                pl.BlockSpec((C, 1), lambda b, h: (0, 0)),                 # global bias
            ],
            out_specs=pl.BlockSpec((1, snip, C, T), lambda b, h: (b, 0, 0, h)),
        ),
        compiler_params=pltpu.CompilerParams(
            dimension_semantics=("parallel", "parallel"),
            vmem_limit_bytes=vmem_limit_bytes,
        ),
        input_output_aliases={0: 0},   # out = x + g : reuse x-block's HBM buffer
    )

    # Donate xk (a fresh buffer produced by reshape/pad, independent of the
    # caller's x) so the input_output_aliases is realized in place instead of
    # XLA inserting a defensive copy.
    run = jax.jit(call, donate_argnums=(0,))
    out = run(xk, we, wg, scale_col, shift_col, bg_col)

    if HW_pad != HW:
        out = out[..., :HW]
    return out.reshape(B_S, C, H, W)


def _reference(x_nchw, snip, params):
    """Pure-JAX reference mirroring the PyTorch forward."""
    B_S, C, H, W = x_nchw.shape
    B = B_S // snip
    x = (x_nchw.reshape(B, snip, C, H, W)
               .transpose(0, 2, 1, 3, 4)
               .reshape(B, C, snip, H * W))
    y = jnp.einsum("oc,bcsl->bosl", params["embed_w"], x) \
        + params["embed_b"][None, :, None, None]
    m = jnp.max(y, axis=2)                                   # (B, C, HW)
    eps = 1e-5
    scale = params["bn_gamma"] / jnp.sqrt(params["bn_var"] + eps)
    shift = params["bn_beta"] - params["bn_mean"] * scale
    n = m * scale[None, :, None] + shift[None, :, None]
    r = jnp.maximum(n, 0.0)
    g = jnp.einsum("oc,bcl->bol", params["global_w"], r) \
        + params["global_b"][None, :, None]
    g = g.reshape(B, 1, C, H, W)
    out = jnp.broadcast_to(g, (B, snip, C, H, W)).reshape(B_S, C, H, W) + x_nchw
    return out


if __name__ == "__main__":
    key = jax.random.PRNGKey(0)
    B, snip, C, H, W = 2, 4, 32, 16, 16        # B_S = B * snip = 8, HW = 256 (lane-dense)
    B_S = B * snip

    keys = jax.random.split(key, 8)
    x = jax.random.normal(keys[0], (B_S, C, H, W), dtype=jnp.float32)

    # Deterministic synthetic parameters.
    # NOTE: the reference module kaiming-inits embed_conv and ZERO-inits
    # global_conv; nonzero deterministic weights are used so the kernel path
    # computes something non-trivial.
    params = {
        "embed_w": 0.1 * jax.random.normal(keys[1], (C, C), dtype=jnp.float32),
        "embed_b": 0.1 * jax.random.normal(keys[2], (C,), dtype=jnp.float32),
        "global_w": 0.1 * jax.random.normal(keys[3], (C, C), dtype=jnp.float32),
        "global_b": 0.1 * jax.random.normal(keys[4], (C,), dtype=jnp.float32),
        "bn_gamma": 1.0 + 0.1 * jax.random.normal(keys[5], (C,), dtype=jnp.float32),
        "bn_beta": 0.1 * jax.random.normal(keys[6], (C,), dtype=jnp.float32),
        "bn_mean": 0.1 * jax.random.normal(keys[7], (C,), dtype=jnp.float32),
        "bn_var": jnp.full((C,), 0.9, dtype=jnp.float32),
    }

    # Reference computed first (kernel donates its own reshaped copy of x).
    ref = _reference(x, snip, params)

    out = temporal_context_block_max(x, snip, params)
    out = jax.block_until_ready(out)

    assert out.shape == (B_S, C, H, W)
    assert jnp.allclose(out, ref, atol=1e-4, rtol=1e-4)

    print("KERNEL_OK")
</pallas_src>

<mosaic_0001>
module attributes {stable_mosaic.version = 11 : i64} {
  func.func @_tcb_kernel(%arg0: i32, %arg1: i32, %arg2: memref<1x4x32x256xf32, #tpu.memory_space<vmem>>, %arg3: memref<32x32xf32, #tpu.memory_space<vmem>>, %arg4: memref<32x32xf32, #tpu.memory_space<vmem>>, %arg5: memref<32x1xf32, #tpu.memory_space<vmem>>, %arg6: memref<32x1xf32, #tpu.memory_space<vmem>>, %arg7: memref<32x1xf32, #tpu.memory_space<vmem>>, %arg8: memref<1x4x32x256xf32, #tpu.memory_space<vmem>>) attributes {dimension_semantics = [#tpu.dimension_semantics<parallel>, #tpu.dimension_semantics<parallel>], iteration_bounds = array<i64: 2, 1>, scalar_prefetch = 0 : i64, scratch_operands = 0 : i64, tpu.core_type = #tpu.core_type<tc>, window_params = [{transform_indices = @transform_0, window_bounds = array<i64: 1, 4, 32, 256>}, {pipeline_mode = #tpu.pipeline_mode<synchronous>, transform_indices = @transform_1, window_bounds = array<i64: 32, 32>}, {pipeline_mode = #tpu.pipeline_mode<synchronous>, transform_indices = @transform_2, window_bounds = array<i64: 32, 32>}, {pipeline_mode = #tpu.pipeline_mode<synchronous>, transform_indices = @transform_3, window_bounds = array<i64: 32, 1>}, {pipeline_mode = #tpu.pipeline_mode<synchronous>, transform_indices = @transform_4, window_bounds = array<i64: 32, 1>}, {pipeline_mode = #tpu.pipeline_mode<synchronous>, transform_indices = @transform_5, window_bounds = array<i64: 32, 1>}, {transform_indices = @transform_6, window_bounds = array<i64: 1, 4, 32, 256>}]} {
    %c0 = arith.constant 0 : index
    %c0_0 = arith.constant 0 : index
    %0 = vector.load %arg3[%c0, %c0_0] : memref<32x32xf32, #tpu.memory_space<vmem>>, vector<32x32xf32>
    %c0_1 = arith.constant 0 : index
    %c0_2 = arith.constant 0 : index
    %1 = vector.load %arg4[%c0_1, %c0_2] : memref<32x32xf32, #tpu.memory_space<vmem>>, vector<32x32xf32>
    %c0_3 = arith.constant 0 : index
    %c0_4 = arith.constant 0 : index
    %c0_5 = arith.constant 0 : index
    %c0_6 = arith.constant 0 : index
    %2 = vector.load %arg2[%c0_3, %c0_4, %c0_5, %c0_6] : memref<1x4x32x256xf32, #tpu.memory_space<vmem>>, vector<1x1x32x256xf32>
    %3 = vector.shape_cast %2 : vector<1x1x32x256xf32> to vector<32x256xf32>
    %cst = arith.constant dense<0.000000e+00> : vector<32x256xf32>
    %4 = tpu.matmul %0, %3, %cst {dimension_numbers = #tpu.dot_dimension_numbers<[1], [0], [0], [1], [0, 0, 1, 1], [], []>} : vector<32x32xf32>, vector<32x256xf32>, vector<32x256xf32> -> vector<32x256xf32>
    %c0_7 = arith.constant 0 : index
    %c1 = arith.constant 1 : index
    %c0_8 = arith.constant 0 : index
    %c0_9 = arith.constant 0 : index
    %5 = vector.load %arg2[%c0_7, %c1, %c0_8, %c0_9] : memref<1x4x32x256xf32, #tpu.memory_space<vmem>>, vector<1x1x32x256xf32>
    %6 = vector.shape_cast %5 : vector<1x1x32x256xf32> to vector<32x256xf32>
    %cst_10 = arith.constant dense<0.000000e+00> : vector<32x256xf32>
    %7 = tpu.matmul %0, %6, %cst_10 {dimension_numbers = #tpu.dot_dimension_numbers<[1], [0], [0], [1], [0, 0, 1, 1], [], []>} : vector<32x32xf32>, vector<32x256xf32>, vector<32x256xf32> -> vector<32x256xf32>
    %8 = arith.maximumf %4, %7 : vector<32x256xf32>
    %c0_11 = arith.constant 0 : index
    %c2 = arith.constant 2 : index
    %c0_12 = arith.constant 0 : index
    %c0_13 = arith.constant 0 : index
    %9 = vector.load %arg2[%c0_11, %c2, %c0_12, %c0_13] : memref<1x4x32x256xf32, #tpu.memory_space<vmem>>, vector<1x1x32x256xf32>
    %10 = vector.shape_cast %9 : vector<1x1x32x256xf32> to vector<32x256xf32>
    %cst_14 = arith.constant dense<0.000000e+00> : vector<32x256xf32>
    %11 = tpu.matmul %0, %10, %cst_14 {dimension_numbers = #tpu.dot_dimension_numbers<[1], [0], [0], [1], [0, 0, 1, 1], [], []>} : vector<32x32xf32>, vector<32x256xf32>, vector<32x256xf32> -> vector<32x256xf32>
    %12 = arith.maximumf %8, %11 : vector<32x256xf32>
    %c0_15 = arith.constant 0 : index
    %c3 = arith.constant 3 : index
    %c0_16 = arith.constant 0 : index
    %c0_17 = arith.constant 0 : index
    %13 = vector.load %arg2[%c0_15, %c3, %c0_16, %c0_17] : memref<1x4x32x256xf32, #tpu.memory_space<vmem>>, vector<1x1x32x256xf32>
    %14 = vector.shape_cast %13 : vector<1x1x32x256xf32> to vector<32x256xf32>
    %cst_18 = arith.constant dense<0.000000e+00> : vector<32x256xf32>
    %15 = tpu.matmul %0, %14, %cst_18 {dimension_numbers = #tpu.dot_dimension_numbers<[1], [0], [0], [1], [0, 0, 1, 1], [], []>} : vector<32x32xf32>, vector<32x256xf32>, vector<32x256xf32> -> vector<32x256xf32>
    %16 = arith.maximumf %12, %15 : vector<32x256xf32>
    %c0_19 = arith.constant 0 : index
    %c0_20 = arith.constant 0 : index
    %17 = vector.load %arg5[%c0_19, %c0_20] : memref<32x1xf32, #tpu.memory_space<vmem>>, vector<32x1xf32>
    %18 = vector.broadcast %17 : vector<32x1xf32> to vector<32x256xf32>
    %19 = arith.mulf %16, %18 : vector<32x256xf32>
    %c0_21 = arith.constant 0 : index
    %c0_22 = arith.constant 0 : index
    %20 = vector.load %arg6[%c0_21, %c0_22] : memref<32x1xf32, #tpu.memory_space<vmem>>, vector<32x1xf32>
    %21 = vector.broadcast %20 : vector<32x1xf32> to vector<32x256xf32>
    %22 = arith.addf %19, %21 : vector<32x256xf32>
    %cst_23 = arith.constant 0.000000e+00 : f32
    %23 = vector.broadcast %cst_23 : f32 to vector<32x256xf32>
    %24 = arith.maximumf %22, %23 : vector<32x256xf32>
    %cst_24 = arith.constant dense<0.000000e+00> : vector<32x256xf32>
    %25 = tpu.matmul %1, %24, %cst_24 {dimension_numbers = #tpu.dot_dimension_numbers<[1], [0], [0], [1], [0, 0, 1, 1], [], []>} : vector<32x32xf32>, vector<32x256xf32>, vector<32x256xf32> -> vector<32x256xf32>
    %c0_25 = arith.constant 0 : index
    %c0_26 = arith.constant 0 : index
    %26 = vector.load %arg7[%c0_25, %c0_26] : memref<32x1xf32, #tpu.memory_space<vmem>>, vector<32x1xf32>
    %27 = vector.broadcast %26 : vector<32x1xf32> to vector<32x256xf32>
    %28 = arith.addf %25, %27 : vector<32x256xf32>
    %c0_27 = arith.constant 0 : index
    %c0_28 = arith.constant 0 : index
    %c0_29 = arith.constant 0 : index
    %c0_30 = arith.constant 0 : index
    %29 = vector.load %arg2[%c0_27, %c0_28, %c0_29, %c0_30] : memref<1x4x32x256xf32, #tpu.memory_space<vmem>>, vector<1x1x32x256xf32>
    %30 = vector.shape_cast %29 : vector<1x1x32x256xf32> to vector<32x256xf32>
    %31 = arith.addf %30, %28 : vector<32x256xf32>
    %c0_31 = arith.constant 0 : index
    %c0_32 = arith.constant 0 : index
    %c0_33 = arith.constant 0 : index
    %c0_34 = arith.constant 0 : index
    %32 = vector.load %arg8[%c0_31, %c0_32, %c0_33, %c0_34] : memref<1x4x32x256xf32, #tpu.memory_space<vmem>>, vector<1x1x32x256xf32>
    %33 = vector.shape_cast %32 : vector<1x1x32x256xf32> to vector<32x256xf32>
    %34 = vector.shape_cast %31 : vector<32x256xf32> to vector<1x1x32x256xf32>
    tpu.vector_store %arg8[%c0_31, %c0_32, %c0_33, %c0_34], %34 {strides = array<i32>} : memref<1x4x32x256xf32, #tpu.memory_space<vmem>>, vector<1x1x32x256xf32>,
    %c0_35 = arith.constant 0 : index
    %c1_36 = arith.constant 1 : index
    %c0_37 = arith.constant 0 : index
    %c0_38 = arith.constant 0 : index
    %35 = vector.load %arg2[%c0_35, %c1_36, %c0_37, %c0_38] : memref<1x4x32x256xf32, #tpu.memory_space<vmem>>, vector<1x1x32x256xf32>
    %36 = vector.shape_cast %35 : vector<1x1x32x256xf32> to vector<32x256xf32>
    %37 = arith.addf %36, %28 : vector<32x256xf32>
    %c0_39 = arith.constant 0 : index
    %c1_40 = arith.constant 1 : index
    %c0_41 = arith.constant 0 : index
    %c0_42 = arith.constant 0 : index
    %38 = vector.load %arg8[%c0_39, %c1_40, %c0_41, %c0_42] : memref<1x4x32x256xf32, #tpu.memory_space<vmem>>, vector<1x1x32x256xf32>
    %39 = vector.shape_cast %38 : vector<1x1x32x256xf32> to vector<32x256xf32>
    %40 = vector.shape_cast %37 : vector<32x256xf32> to vector<1x1x32x256xf32>
    tpu.vector_store %arg8[%c0_39, %c1_40, %c0_41, %c0_42], %40 {strides = array<i32>} : memref<1x4x32x256xf32, #tpu.memory_space<vmem>>, vector<1x1x32x256xf32>,
    %c0_43 = arith.constant 0 : index
    %c2_44 = arith.constant 2 : index
    %c0_45 = arith.constant 0 : index
    %c0_46 = arith.constant 0 : index
    %41 = vector.load %arg2[%c0_43, %c2_44, %c0_45, %c0_46] : memref<1x4x32x256xf32, #tpu.memory_space<vmem>>, vector<1x1x32x256xf32>
    %42 = vector.shape_cast %41 : vector<1x1x32x256xf32> to vector<32x256xf32>
    %43 = arith.addf %42, %28 : vector<32x256xf32>
    %c0_47 = arith.constant 0 : index
    %c2_48 = arith.constant 2 : index
    %c0_49 = arith.constant 0 : index
    %c0_50 = arith.constant 0 : index
    %44 = vector.load %arg8[%c0_47, %c2_48, %c0_49, %c0_50] : memref<1x4x32x256xf32, #tpu.memory_space<vmem>>, vector<1x1x32x256xf32>
    %45 = vector.shape_cast %44 : vector<1x1x32x256xf32> to vector<32x256xf32>
    %46 = vector.shape_cast %43 : vector<32x256xf32> to vector<1x1x32x256xf32>
    tpu.vector_store %arg8[%c0_47, %c2_48, %c0_49, %c0_50], %46 {strides = array<i32>} : memref<1x4x32x256xf32, #tpu.memory_space<vmem>>, vector<1x1x32x256xf32>,
    %c0_51 = arith.constant 0 : index
    %c3_52 = arith.constant 3 : index
    %c0_53 = arith.constant 0 : index
    %c0_54 = arith.constant 0 : index
    %47 = vector.load %arg2[%c0_51, %c3_52, %c0_53, %c0_54] : memref<1x4x32x256xf32, #tpu.memory_space<vmem>>, vector<1x1x32x256xf32>
    %48 = vector.shape_cast %47 : vector<1x1x32x256xf32> to vector<32x256xf32>
    %49 = arith.addf %48, %28 : vector<32x256xf32>
    %c0_55 = arith.constant 0 : index
    %c3_56 = arith.constant 3 : index
    %c0_57 = arith.constant 0 : index
    %c0_58 = arith.constant 0 : index
    %50 = vector.load %arg8[%c0_55, %c3_56, %c0_57, %c0_58] : memref<1x4x32x256xf32, #tpu.memory_space<vmem>>, vector<1x1x32x256xf32>
    %51 = vector.shape_cast %50 : vector<1x1x32x256xf32> to vector<32x256xf32>
    %52 = vector.shape_cast %49 : vector<32x256xf32> to vector<1x1x32x256xf32>
    tpu.vector_store %arg8[%c0_55, %c3_56, %c0_57, %c0_58], %52 {strides = array<i32>} : memref<1x4x32x256xf32, #tpu.memory_space<vmem>>, vector<1x1x32x256xf32>,
    return
  }
  func.func @transform_0(%arg0: i32, %arg1: i32) -> (i32, i32, i32, i32) {
    %c0_i32 = arith.constant 0 : i32
    %c0_i32_0 = arith.constant 0 : i32
    %c0_i32_1 = arith.constant 0 : i32
    return %arg0, %c0_i32, %c0_i32_0, %arg1 : i32, i32, i32, i32
  }
  func.func @transform_1(%arg0: i32, %arg1: i32) -> (i32, i32) {
    %c0_i32 = arith.constant 0 : i32
    %c0_i32_0 = arith.constant 0 : i32
    %c0_i32_1 = arith.constant 0 : i32
    return %c0_i32, %c0_i32_0 : i32, i32
  }
  func.func @transform_2(%arg0: i32, %arg1: i32) -> (i32, i32) {
    %c0_i32 = arith.constant 0 : i32
    %c0_i32_0 = arith.constant 0 : i32
    %c0_i32_1 = arith.constant 0 : i32
    return %c0_i32, %c0_i32_0 : i32, i32
  }
  func.func @transform_3(%arg0: i32, %arg1: i32) -> (i32, i32) {
    %c0_i32 = arith.constant 0 : i32
    %c0_i32_0 = arith.constant 0 : i32
    %c0_i32_1 = arith.constant 0 : i32
    return %c0_i32, %c0_i32_0 : i32, i32
  }
  func.func @transform_4(%arg0: i32, %arg1: i32) -> (i32, i32) {
    %c0_i32 = arith.constant 0 : i32
    %c0_i32_0 = arith.constant 0 : i32
    %c0_i32_1 = arith.constant 0 : i32
    return %c0_i32, %c0_i32_0 : i32, i32
  }
  func.func @transform_5(%arg0: i32, %arg1: i32) -> (i32, i32) {
    %c0_i32 = arith.constant 0 : i32
    %c0_i32_0 = arith.constant 0 : i32
    %c0_i32_1 = arith.constant 0 : i32
    return %c0_i32, %c0_i32_0 : i32, i32
  }
  func.func @transform_6(%arg0: i32, %arg1: i32) -> (i32, i32, i32, i32) {
    %c0_i32 = arith.constant 0 : i32
    %c0_i32_0 = arith.constant 0 : i32
    %c0_i32_1 = arith.constant 0 : i32
    return %arg0, %c0_i32, %c0_i32_0, %arg1 : i32, i32, i32, i32
  }
}

</mosaic_0001>

<bundles_post_ra>
// kernel: tpu_custom_call.1
= control target key start
LH: loop header
LB: loop body
LE: loop exit
PB: predicated region body
PF: predicated region fallthrough
CT: control target
= control target key end

     0   :  { %11 = vsyncpa [#allocation3], 0  ;;  %s1997_s0 = inlined_call_operand.hbm [shape: f32[2,4,32,256], index: 0, kind: input, shape index: {}, may-alias: {0,6}]   ;;  %s1998_s1 = inlined_call_operand.vmem [shape: f32[32,32], index: 1, kind: input, shape index: {}]   ;;  %s1999_s2 = inlined_call_operand.vmem [shape: f32[32,32], index: 2, kind: input, shape index: {}]   ;;  %s2000_s3 = inlined_call_operand.vmem [shape: f32[32,1], index: 3, kind: input, shape index: {}]   ;;  %s2001_s4 = inlined_call_operand.vmem [shape: f32[32,1], index: 4, kind: input, shape index: {}]   ;;  %s2002_s5 = inlined_call_operand.vmem [shape: f32[32,1], index: 5, kind: input, shape index: {}]   ;;  %s2003_s6 = inlined_call_operand.hbm [shape: f32[2,4,32,256], index: 6, kind: output, shape index: {}, may-alias: {0,6}]  }
   0x1   :  { %13 = vsyncpa [#allocation3 + $0x1], 0 }
   0x2   :  { %14 = vsyncpa [#allocation4], 0 }
   0x3   :  { %16 = vsyncpa [#allocation4 + $0x1], 0  ;;  %s1497_s21 = smov 0   ;;  %s1499_s22 = smov 0  }
   0x4   :  { %s1501_s23 = smov 0   ;;  %s1503_s24 = smov 0  }
   0x5   :  { %s1505_s25 = smov 0   ;;  %s1507_s26 = smov 0  }
   0x6 LB: > { %s1117_s27 = sadd.s32 4294967295, %s1452_s26   ;;  %s1118_s28 = sadd.s32 4294967294, %s1452_s26   ;;  %s1452_s26 = sphi %s1507_s26, %s22_s26   ;;  %s1448_s25 = sphi %s1505_s25, %s2021_s25   ;;  %s1444_s24 = sphi %s1503_s24, %s2020_s24   ;;  %s1440_s23 = sphi %s1501_s23, %s2019_s23   ;;  %s1436_s22 = sphi %s1499_s22, %s2018_s22   ;;  %s1432_s21 = sphi %s1497_s21, %s2017_s21  }
   0x7   : > { %s34_s29 = sadd.s32 1, %s1448_s25  ;;  %s43_s30 = sadd.s32 1, %s1440_s23 }
   0x8   : > { %p36_p0 = scmp.ge.s32.totalorder %s34_s29, 2  ;;  %p50_p1 = scmp.ne.s32.totalorder %s1440_s23, %s1436_s22 }
   0x9   : > { %p51_p2 = scmp.eq.s32.totalorder %s1452_s26, 0  ;;  %p56_p3 = scmp.ne.s32.totalorder %s1436_s22, %s1432_s21 }
   0xa   : > { %s2023_s29 = smov (%p36_p0, %s34_s29), 0  ;;  %p57_p5 = scmp.eq.s32.totalorder %s1117_s27, 0 }
   0xb   : > { %p1538_p4 = por %p51_p2, %p50_p1  ;;  %s38_s8 = ssub.s32 %s1448_s25, %s2023_s29 }
   0xc   : > { %p187_p6 = scmp.eq.s32.totalorder %s1117_s27, 1  ;;  %p41_p7 = scmp.eq.s32.totalorder %s38_s8, 0 }
   0xd   : > { %p1544_p8 = por %p57_p5, %p56_p3  ;;  %p193_p10 = scmp.eq.s32.totalorder %s1118_s28, 1 }
   0xe   : > { %p1548_p9 = por %p187_p6, %p50_p1  ;;  %p1282_p13 = scmp.lt.s32.totalorder %s1452_s26, 2 }
   0xf   : > { %s1553_s11 = scalar_select %p41_p7, %s1440_s23, %s43_s30  }
  0x10   : > { %s2009_s10 = scalar_select %p1548_p9, 1, 0 }
  0x11   : > { %p1555_p11 = por %p193_p10, %p56_p3  ;;  %s228_s13 = sand.u32 1, %s1440_s23  }
  0x12   : > { %s1121_s14 = sshll.u32 %s228_s13, 8  ;;  %s1224_s15 = sshll.u32 %s1448_s25, 12 }
  0x13   : > { %s2010_s12 = scalar_select %p1555_p11, 1, 0 }
  0x14   : > { %s1566_s18 = scalar_lea.hbm %s1997_s0, %s1224_s15  ;;  %s232_s19 = scalar_lea.vmem [#allocation2], %s1121_s14 }
  0x15   : > { %s241_s20 = sshll.u32 %s232_s19, 4  ;;  %p1572_p0 = pnand %p1282_p13, %p1538_p4  ;;  %s1568_s20 = int_to_ptr.vmem [resolvable:$true] %s241_s20 }
  0x16   : > { %s1577_s28 = scalar_lea.sflag [#allocation3], %s228_s13  ;;  %s1340_s30 = scalar_lea.hbm %s1566_s18, 4096 }
  0x17   : > { %p1341_p2 = scmp.ne.s32.totalorder %s1566_s18, %s1340_s30  ;;  %p1342_p3 = pneg %p1572_p0 }
  0x18   : > { %s1345_s7 = scalar_lea.hbm %s1997_s0, 8192  ;;  %p1346_p4 = scmp.lt.u32.totalorder %s1566_s18, %s1997_s0 }
  0x19   : > { %p1343_p5 = pnand %p1342_p3, %p1341_p2  ;;  %p1347_p7 = scmp.lt.u32.totalorder %s1345_s7, %s1340_s30 }
  0x1a   : > { %p1349_p13 = scmp.lt.u32.totalorder %s1340_s30, %s1566_s18 }
  0x1b   : > { %p1344_p6 = pneg %p1343_p5  ;;  %p1348_p10 = por %p1347_p7, %p1346_p4 }
  0x1d   : > { %p1350_p12 = por %p1349_p13, %p1348_p10 }
  0x1f   : > { %p1351_p1 = pnand %p1350_p12, %p1344_p6 }
  0x21   : > { %1354 = shalt.err (!%p1351_p1)
}
  0x22   : > { %s1355_s13 = scalar_lea.vmem %s1568_s20, 4096  ;;  %s1454_s17 = smov [#allocation2]  }
  0x23   : > { %p1356_p2 = scmp.ne.s32.totalorder %s1568_s20, %s1355_s13  ;;  %s1360_s19 = sshll.u32 %s1454_s17, 4  ;;  %s1361_s19 = int_to_ptr.vmem [resolvable:$false] %s1360_s19 }
  0x24   : > { %s1362_s8 = scalar_lea.vmem %s1361_s19, 8192  ;;  %p1363_p9 = scmp.lt.s32.totalorder %s1568_s20, %s1361_s19 }
  0x25   : > { %p1358_p5 = pnand %p1356_p2, %p1342_p3  ;;  %p1364_p4 = scmp.lt.s32.totalorder %s1362_s8, %s1355_s13 }
  0x27   : > { %p1359_p11 = pneg %p1358_p5  ;;  %p1365_p7 = por %p1364_p4, %p1363_p9 }
  0x29   : > { %p1366_p10 = pnand %p1365_p7, %p1359_p11 }
  0x2b   : > { %1369 = shalt.err (!%p1366_p10)
}
  0x2c   : > { %s1455_s30 = smov 256   ;;  %s1456_s14 = smov 16  }
  0x2d   : > { %1277 = dma.hbm_to_vmem [thread:$0]  (!%p1572_p0), %s1566_s18, 4096, %s1568_s20, %s1577_s28, %s1455_s30, %s1455_s30, %s1456_s14  }
  0x2e   : > { %p249_p12 = scmp.lt.s32.totalorder %s1452_s26, 3  ;;  %p2012_p1 = scmp.ge.s32.totalorder %s1452_s26, 1 }
  0x30   : > { %p250_p3 = pnand %p2012_p1, %p249_p12 }
  0x31   : > { %s1609_s7 = sand.u32 (!%p250_p3), 1, %s1436_s22  }
  0x32   : > { %253 = sbr.rel (%p250_p3) target bundleno = 578 (0x242), region = 44  ;;  %s1125_s15 = sshll.u32 (!%p250_p3), %s1609_s7, 8 }
  0x33   : > { %s256_s16 = scalar_lea.sflag (!%p250_p3), [#allocation3], %s1609_s7  ;;  %s1615_s13 = scalar_lea.vmem (!%p250_p3), [#allocation2], %s1125_s15 }
  0x39   : > { %1423 = dma.done.wait (%p1544_p8), %s256_s16, 4096  }
  0x3a   : > { %1425 = vsyncadd (%p1544_p8), %s256_s16, 4294963200  ;;  %v2005_v0 = vmov 0.0   ;;  %v1458_v1 = vmov 0   ;;  %v1624_v2 = vld [vmem:[%s1615_s13 + $0x8] sm:$0xff]  ;;  %v1627_v3 = vld [vmem:[%s1615_s13 + $0x18] sm:$0xff]  ;;  %vm306_vm0 = vcmask 261120  }
  0x3b   : > { %395 = vmatprep.mubr.f32.mxu1 %v2005_v0  ;;  %383 = vmatprep.mubr.f32.mxu0 %v2005_v0  ;;  %v1630_v4 = vld [vmem:[%s1615_s13] sm:$0xff]  ;;  %v1226_v5 = vpack.c.bf16 %v1627_v3, %v1624_v2  ;;  %v1635_v6 = vld [vmem:[%s1615_s13 + $0x10] sm:$0xff]  ;;  %v1638_v7 = vld [vmem:[%s1615_s13 + $0x28] sm:$0xff]  ;;  %s1015_s30 = scalar_lea.sflag [#allocation4], %s1609_s7  ;;  %p2014_p9 = scmp.ne.s32.totalorder %s2009_s10, 0 }
  0x3c   : > { %1338 = vset.pattern.permute.xlu0 %v1458_v1  ;;  %1339 = vset.pattern.permute.xlu1 %v1458_v1  ;;  %v1641_v8 = vld [vmem:[%s1615_s13 + $0x38] sm:$0xff]  ;;  %v1228_v9 = vpack.c.bf16 %v1635_v6, %v1630_v4  ;;  %v1648_v11 = vld [vmem:[%s1615_s13 + $0x20] sm:$0xff]  ;;  %v1651_v12 = vld [vmem:[%s1615_s13 + $0x30] sm:$0xff]  ;;  %s1459_s16 = smov [#allocation5]  }
  0x3d   : > { %v1230_v10 = vpack.c.bf16 %v1641_v8, %v1638_v7  ;;  %1266 = vmatprep.subr.bf16.mxu1 %v1226_v5  ;;  %1227 = vmatprep.subr.bf16.mxu0 %v1226_v5  ;;  %v1654_v13 = vld [vmem:[%s1615_s13 + $0x48] sm:$0xff]  ;;  %v1657_v14 = vld [vmem:[%s1615_s13 + $0x58] sm:$0xff]  ;;  %v1232_v15 = vpack.c.bf16 %v1651_v12, %v1648_v11  ;;  %v1662_v16 = vld [vmem:[%s1615_s13 + $0x40] sm:$0xff]  ;;  %s1374_s9 = sshll.u32 %s1459_s16, 4  ;;  %s1375_s9 = int_to_ptr.vmem [resolvable:$false] %s1374_s9 }
  0x3e   : > { %1268 = vmatpush1.bf16.msra.mxu1 %v1228_v9  ;;  %1229 = vmatpush1.bf16.msra.mxu0 %v1228_v9  ;;  %v1665_v17 = vld [vmem:[%s1615_s13 + $0x88] sm:$0xff]  ;;  %v1234_v18 = vpack.c.bf16 %v1657_v14, %v1654_v13  ;;  %v1670_v19 = vld [vmem:[%s1615_s13 + $0x50] sm:$0xff]  ;;  %v1673_v20 = vld [vmem:[%s1615_s13 + $0x98] sm:$0xff]  ;;  %s1376_s18 = scalar_lea.vmem %s1375_s9, 8192 }
  0x3f   : > { %1267 = vmatprep.subr.bf16.mxu1 %v1230_v10  ;;  %1231 = vmatprep.subr.bf16.mxu0 %v1230_v10  ;;  %v1676_v21 = vld [vmem:[%s1615_s13 + $0x80] sm:$0xff]  ;;  %v1242_v22 = vpack.c.bf16 %v1673_v20, %v1665_v17  ;;  %v1681_v23 = vld [vmem:[%s1615_s13 + $0x90] sm:$0xff]  ;;  %v1684_v24 = vld [vmem:[%s1615_s13 + $0x68] sm:$0xff]  ;;  %v1236_v27 = vpack.c.bf16 %v1670_v19, %v1662_v16 }
  0x40   : > { %v1687_v25 = vld [vmem:[%s1615_s13 + $0x78] sm:$0xff]  ;;  %v1692_v26 = vld [vmem:[%s1998_s1 + $0x10] sm:$0xff]  ;;  %v1699_v28 = vld [vmem:[%s1998_s1] sm:$0xff]  ;;  %v1244_v31 = vpack.c.bf16 %v1681_v23, %v1676_v21 }
  0x41   : > { %v1702_v29 = vld [vmem:[%s1615_s13 + $0xa8] sm:$0xff]  ;;  %v1705_v30 = vld [vmem:[%s1615_s13 + $0xb8] sm:$0xff]  ;;  %v1238_v32 = vpack.c.bf16 %v1687_v25, %v1684_v24  ;;  %v1712_v33 = vld [vmem:[%s1615_s13 + $0x60] sm:$0xff] }
  0x42   : > { %1269 = vmatpush1.bf16.msra.mxu1 %v1232_v15  ;;  %1233 = vmatpush1.bf16.msra.mxu0 %v1232_v15  ;;  %v1715_v34 = vld [vmem:[%s1615_s13 + $0x70] sm:$0xff]  ;;  %v1246_v35 = vpack.c.bf16 %v1705_v30, %v1702_v29  ;;  %v1720_v36 = vld [vmem:[%s1615_s13 + $0xa0] sm:$0xff]  ;;  %v1730_v38 = vld [vmem:[%s1615_s13 + $0xc8] sm:$0xff] }
  0x43   : > { %1235 = vmatprep.subr.bf16.mxu1 %v1234_v18  ;;  %1243 = vmatprep.subr.bf16.mxu0 %v1242_v22  ;;  %v1723_v37 = vld [vmem:[%s1615_s13 + $0xb0] sm:$0xff]  ;;  %v1733_v39 = vld [vmem:[%s1615_s13 + $0xd8] sm:$0xff]  ;;  %v1240_v41 = vpack.c.bf16 %v1715_v34, %v1712_v33  ;;  %v1746_v42 = vld [vmem:[%s1998_s1 + $0x8] sm:$0xff] }
  0x44   : > { %v1739_v40 = vld [vmem:[%s1998_s1 + $0x18] sm:$0xff]  ;;  %v1248_v43 = vpack.c.bf16 %v1723_v37, %v1720_v36  ;;  %v1250_v44 = vpack.c.bf16 %v1733_v39, %v1730_v38  ;;  %v1754_v45 = vld [vmem:[%s1615_s13 + $0xc0] sm:$0xff]  ;;  %v1757_v46 = vld [vmem:[%s1615_s13 + $0xd0] sm:$0xff] }
  0x45   : > { %1129 = vmatmul.mubr.msk.f32.vlgmr.msra.gmra.mrb[0].mxu1 %vm306_vm0, %v1692_v26  ;;  %1127 = vmatmul.mubr.msk.f32.vlgmr.msra.gmra.mrb[0].mxu0 %vm306_vm0, %v1699_v28  ;;  %v1764_v47 = vld [vmem:[%s1615_s13 + $0xe8] sm:$0xff]  ;;  %v1767_v48 = vld [vmem:[%s1615_s13 + $0xf8] sm:$0xff]  ;;  %v726_v49 = vld [vmem:[%s2000_s3] sm:$0xff]  ;;  %v1252_v51 = vpack.c.bf16 %v1757_v46, %v1754_v45 }
  0x46   : > { %1237 = vmatpush1.bf16.msra.mxu1 %v1236_v27  ;;  %401 = vmatprep.mubr.f32.mxu1 %v2005_v0  ;;  %v758_v50 = vld [vmem:[%s2001_s4] sm:$0xff]  ;;  %v1254_v52 = vpack.c.bf16 %v1767_v48, %v1764_v47  ;;  %v1785_v54 = vld [vmem:[%s1615_s13 + $0xf0] sm:$0xff]  ;;  %v727_v55 = vld [vmem:[%s2000_s3 + $0x8] sm:$0xff] }
  0x47   : > { %1245 = vmatpush1.bf16.msra.mxu0 %v1244_v31  ;;  %1239 = vmatprep.subr.bf16.mxu1 %v1238_v32  ;;  %v1782_v53 = vld [vmem:[%s1615_s13 + $0xe0] sm:$0xff]  ;;  %v759_v56 = vld [vmem:[%s2001_s4 + $0x8] sm:$0xff]  ;;  %v728_v58 = vld [vmem:[%s2000_s3 + $0x10] sm:$0xff]  ;;  %s1883_s13 = scalar_lea.vmem [#allocation5], %s1125_s15  ;;  %s1225_s15 = sshll.u32 %s1444_s24, 12 }
  0x48   : > { %389 = vmatprep.mubr.f32.mxu0 %v2005_v0  ;;  %1247 = vmatprep.subr.bf16.mxu0 %v1246_v35  ;;  %v1256_v57 = vpack.c.bf16 %v1785_v54, %v1782_v53  ;;  %v729_v59 = vld [vmem:[%s2000_s3 + $0x18] sm:$0xff]  ;;  %v760_v60 = vld [vmem:[%s2001_s4 + $0x10] sm:$0xff]  ;;  %v798_v62 = vld [vmem:[%s2002_s5] sm:$0xff]  ;;  %s1030_s17 = sshll.u32 %s1883_s13, 4  ;;  %s1934_s8 = scalar_lea.hbm %s2003_s6, %s1225_s15  ;;  %s1936_s17 = int_to_ptr.vmem [resolvable:$true] %s1030_s17 }
  0x49   : > { %1130 = vmatmul.mubr.msk.f32.gmra.mrb[2].mxu1 %vm306_vm0, %v1739_v40  ;;  %1128 = vmatmul.mubr.msk.f32.gmra.mrb[2].mxu0 %vm306_vm0, %v1746_v42  ;;  %v761_v61 = vld [vmem:[%s2001_s4 + $0x18] sm:$0xff]  ;;  %v799_v63 = vld [vmem:[%s2002_s5 + $0x8] sm:$0xff]  ;;  %v800_v1 = vld [vmem:[%s2002_s5 + $0x10] sm:$0xff]  ;;  %s1370_s14 = scalar_lea.vmem %s1936_s17, 4096  ;;  %p1377_p6 = scmp.lt.s32.totalorder %s1936_s17, %s1375_s9 }
  0x4a   : > { %1241 = vmatpush1.bf16.msra.mxu1 %v1240_v41  ;;  %481 = vmatprep.mubr.f32.mxu1 %v2005_v0  ;;  %v801_v5 = vld [vmem:[%s2002_s5 + $0x18] sm:$0xff]  ;;  %p1371_p8 = scmp.ne.s32.totalorder %s1936_s17, %s1370_s14  ;;  %p1378_p13 = scmp.lt.s32.totalorder %s1376_s18, %s1370_s14 }
  0x4b   : > { %1249 = vmatpush1.bf16.msra.mxu0 %v1248_v43  ;;  %587 = vmatprep.mubr.f32.mxu0 %v2005_v0 }
  0x4c   : > { %1251 = vmatprep.subr.bf16.mxu1 %v1250_v44  ;;  %732 = vperm.xlu0 %1338, %v726_v49   ;;  %p1372_p11 = pnand %p1371_p8, %p2014_p9  ;;  %p1379_p2 = por %p1378_p13, %p1377_p6 }
  0x4d   : > { %1139 = vmatmul.mubr.msk.f32.vlgmr.msra.gmra.mrb[4].mxu1 %vm306_vm0, %v1699_v28  ;;  %764 = vperm.xlu1 %1339, %v758_v50  }
  0x4e   : > { %1151 = vmatmul.mubr.msk.f32.vlgmr.msra.gmra.mrb[4].mxu0 %vm306_vm0, %v1699_v28  ;;  %487 = vmatprep.mubr.f32.mxu1 %v2005_v0  ;;  %p1373_p0 = pneg %p1372_p11 }
  0x4f   : > { %593 = vmatprep.mubr.f32.mxu0 %v2005_v0  ;;  %1253 = vmatpush1.bf16.msra.mxu1 %v1252_v51 }
  0x50   : > { %1255 = vmatprep.subr.bf16.mxu1 %v1254_v52  ;;  %737 = vperm.xlu0 %1338, %v727_v55   ;;  %p1380_p5 = pnand %p1379_p2, %p1373_p0 }
  0x51   : > { %1140 = vmatmul.mubr.msk.f32.gmra.mrb[6].mxu1 %vm306_vm0, %v1746_v42  ;;  %769 = vperm.xlu1 %1339, %v759_v56  }
  0x52   : > { %1152 = vmatmul.mubr.msk.f32.gmra.mrb[6].mxu0 %vm306_vm0, %v1746_v42  ;;  %493 = vmatprep.mubr.f32.mxu1 %v2005_v0 }
  0x53   : > { %599 = vmatprep.mubr.f32.mxu0 %v2005_v0  ;;  %1257 = vmatpush1.bf16.msra.mxu1 %v1256_v57 }
  0x54   : > { %742 = vperm.xlu0 %1338, %v728_v58  }
  0x55   : > { %1141 = vmatmul.mubr.msk.f32.gmra.mrb[8].mxu1 %vm306_vm0, %v1692_v26  ;;  %747 = vperm.xlu1 %1339, %v729_v59  }
  0x56   : > { %1153 = vmatmul.mubr.msk.f32.gmra.mrb[8].mxu0 %vm306_vm0, %v1692_v26  ;;  %499 = vmatprep.mubr.f32.mxu1 %v2005_v0 }
  0x57   : > { %605 = vmatprep.mubr.f32.mxu0 %v2005_v0 }
  0x58   : > { %774 = vperm.xlu0 %1338, %v760_v60  }
  0x59   : > { %1142 = vmatmul.mubr.msk.f32.gmra.mrb[10].mxu1 %vm306_vm0, %v1739_v40  ;;  %779 = vperm.xlu1 %1339, %v761_v61  }
  0x5a   : > { %1154 = vmatmul.mubr.msk.f32.gmra.mrb[10].mxu0 %vm306_vm0, %v1739_v40  ;;  %693 = vmatprep.mubr.f32.mxu1 %v2005_v0 }
  0x5b   : > { %898 = vmatprep.mubr.f32.mxu0 %v2005_v0 }
  0x5c   : > { %804 = vperm.xlu0 %1338, %v798_v62  }
  0x5d   : > { %1163 = vmatmul.mubr.msk.f32.vlgmr.msra.gmra.mrb[12].mxu1 %vm306_vm0, %v1699_v28  ;;  %809 = vperm.xlu1 %1339, %v799_v63  }
  0x5e   : > { %699 = vmatprep.mubr.f32.mxu1 %v2005_v0 }
  0x60   : > { %814 = vperm.xlu0 %1338, %v800_v1  }
  0x61   : > { %1164 = vmatmul.mubr.msk.f32.gmra.mrb[14].mxu1 %vm306_vm0, %v1746_v42  ;;  %819 = vperm.xlu1 %1339, %v801_v5  }
  0x62   : > { %705 = vmatprep.mubr.f32.mxu1 %v2005_v0 }
  0x65   : > { %1165 = vmatmul.mubr.msk.f32.gmra.mrb[16].mxu1 %vm306_vm0, %v1692_v26 }
  0x66   : > { %711 = vmatprep.mubr.f32.mxu1 %v2005_v0 }
  0x69   : > { %1166 = vmatmul.mubr.msk.f32.gmra.mrb[18].mxu1 %vm306_vm0, %v1739_v40 }
 0x118   : > { %v397_v9 = vpop.f32.mrb[0].mxu1  ;;  %v385_v10 = vpop.f32.mrb[0].mxu0 }
 0x119   : > { %v399_v15 = vpop.f32.mrb[1].mxu1  ;;  %v387_v18 = vpop.f32.mrb[1].mxu0 }
 0x11c   : > { %v403_v22 = vpop.f32.mrb[2].mxu1  ;;  %v391_v27 = vpop.f32.mrb[2].mxu0 }
 0x11d   : > { %v405_v28 = vpop.f32.mrb[3].mxu1  ;;  %v393_v31 = vpop.f32.mrb[3].mxu0 }
 0x120   : > { %v483_v32 = vpop.f32.mrb[4].mxu1 }
 0x121   : > { %v506_v35 = vmax.f32 %v385_v10, %v483_v32  ;;  %v485_v41 = vpop.f32.mrb[5].mxu1  ;;  %v589_v42 = vpop.f32.mrb[4].mxu0 }
 0x122   : > { %v507_v43 = vmax.f32 %v387_v18, %v485_v41  ;;  %v591_v44 = vpop.f32.mrb[5].mxu0  ;;  %v733_v10 = vpop.permute.xlu0 %732 }
 0x123   : > { %v612_v26 = vmax.f32 %v506_v35, %v589_v42 }
 0x124   : > { %v613_v49 = vmax.f32 %v507_v43, %v591_v44  ;;  %v489_v50 = vpop.f32.mrb[6].mxu1 }
 0x125   : > { %v508_v51 = vmax.f32 %v391_v27, %v489_v50  ;;  %v491_v52 = vpop.f32.mrb[7].mxu1  ;;  %v595_v40 = vpop.f32.mrb[6].mxu0 }
 0x126   : > { %v509_v55 = vmax.f32 %v393_v31, %v491_v52  ;;  %v597_v56 = vpop.f32.mrb[7].mxu0  ;;  %v765_v27 = vpop.permute.xlu1 %764 }
 0x127   : > { %v614_v57 = vmax.f32 %v508_v51, %v595_v40 }
 0x128   : > { %v615_v58 = vmax.f32 %v509_v55, %v597_v56  ;;  %v495_v59 = vpop.f32.mrb[8].mxu1 }
 0x129   : > { %v510_v60 = vmax.f32 %v397_v9, %v495_v59  ;;  %v497_v61 = vpop.f32.mrb[9].mxu1  ;;  %v601_v62 = vpop.f32.mrb[8].mxu0 }
 0x12a   : > { %v511_v63 = vmax.f32 %v399_v15, %v497_v61  ;;  %v603_v1 = vpop.f32.mrb[9].mxu0  ;;  %v738_v9 = vpop.permute.xlu0 %737 }
 0x12b   : > { %v616_v5 = vmax.f32 %v510_v60, %v601_v62  ;;  %v770_v15 = vpop.permute.xlu1 %769 }
 0x12c   : > { %v617_v18 = vmax.f32 %v511_v63, %v603_v1  ;;  %v501_v32 = vpop.f32.mrb[10].mxu1 }
 0x12d   : > { %v512_v35 = vmax.f32 %v403_v22, %v501_v32  ;;  %v503_v41 = vpop.f32.mrb[11].mxu1  ;;  %v607_v42 = vpop.f32.mrb[10].mxu0 }
 0x12e   : > { %v513_v43 = vmax.f32 %v405_v28, %v503_v41  ;;  %v609_v44 = vpop.f32.mrb[11].mxu0  ;;  %v743_v32 = vpop.permute.xlu0 %742 }
 0x12f   : > { %v618_v31 = vmax.f32 %v512_v35, %v607_v42 }
 0x130   : > { %v619_v50 = vmax.f32 %v513_v43, %v609_v44  ;;  %v695_v51 = vpop.f32.mrb[12].mxu1 }
 0x131   : > { %v718_v52 = vmax.f32 %v612_v26, %v695_v51  ;;  %v697_v40 = vpop.f32.mrb[13].mxu1  ;;  %v748_v26 = vpop.permute.xlu1 %747 }
 0x132   : > { %v719_v55 = vmax.f32 %v613_v49, %v697_v40 }
 0x133   : > { %v750_v56 = vmul.f32 %v733_v10, %v718_v52 }
 0x134   : > { %v751_v59 = vmul.f32 %v733_v10, %v719_v55  ;;  %v701_v60 = vpop.f32.mrb[14].mxu1 }
 0x135   : > { %v720_v61 = vmax.f32 %v614_v57, %v701_v60  ;;  %v703_v62 = vpop.f32.mrb[15].mxu1  ;;  %v782_v22 = vadd.f32 %v765_v27, %v750_v56 }
 0x136   : > { %v721_v63 = vmax.f32 %v615_v58, %v703_v62  ;;  %v783_v0 = vadd.f32 %v765_v27, %v751_v59  ;;  %v775_v62 = vpop.permute.xlu0 %774 }
 0x137   : > { %v752_v1 = vmul.f32 %v738_v9, %v720_v61  ;;  %v790_v49 = vmax.f32 %v782_v22, 0.0 }
 0x138   : > { %v753_v28 = vmul.f32 %v738_v9, %v721_v63  ;;  %v707_v41 = vpop.f32.mrb[16].mxu1  ;;  %v791_v10 = vmax.f32 %v783_v0, 0.0 }
 0x139   : > { %v784_v35 = vadd.f32 %v770_v15, %v752_v1  ;;  %v722_v42 = vmax.f32 %v616_v5, %v707_v41  ;;  %v709_v43 = vpop.f32.mrb[17].mxu1  ;;  %v780_v5 = vpop.permute.xlu1 %779 }
 0x13a   : > { %v785_v44 = vadd.f32 %v770_v15, %v753_v28  ;;  %v723_v51 = vmax.f32 %v617_v18, %v709_v43  ;;  %v295_v43 = vld [vmem:[%s1999_s2 + $0x8] sm:$0xff] }
 0x13b   : > { %v792_v52 = vmax.f32 %v784_v35, 0.0  ;;  %v754_v40 = vmul.f32 %v743_v32, %v722_v42 }
 0x13c   : > { %v793_v55 = vmax.f32 %v785_v44, 0.0  ;;  %v755_v57 = vmul.f32 %v743_v32, %v723_v51  ;;  %v713_v60 = vpop.f32.mrb[18].mxu1  ;;  %v297_v44 = vld [vmem:[%s1999_s2 + $0x18] sm:$0xff]  ;;  %v805_v51 = vpop.permute.xlu0 %804 }
 0x13d   : > { %v1260_v58 = vpack.c.bf16 %v792_v52, %v790_v49  ;;  %v724_v56 = vmax.f32 %v618_v31, %v713_v60  ;;  %v715_v61 = vpop.f32.mrb[19].mxu1  ;;  %v786_v59 = vadd.f32 %v775_v62, %v754_v40  ;;  %v294_v31 = vld [vmem:[%s1999_s2] sm:$0xff] }
 0x13e   : > { %v725_v27 = vmax.f32 %v619_v50, %v715_v61  ;;  %v1258_v9 = vpack.c.bf16 %v793_v55, %v791_v10  ;;  %v787_v1 = vadd.f32 %v775_v62, %v755_v57  ;;  %v2013_v50 = vmov 0.0  }
 0x13f   : > { %v756_v63 = vmul.f32 %v748_v26, %v724_v56  ;;  %v794_v22 = vmax.f32 %v786_v59, 0.0  ;;  %v810_v56 = vpop.permute.xlu1 %809 }
 0x140   : > { %v757_v41 = vmul.f32 %v748_v26, %v725_v27  ;;  %1259 = vmatprep.subr.bf16.mxu0 %v1258_v9  ;;  %v795_v28 = vmax.f32 %v787_v1, 0.0  ;;  %v296_v26 = vld [vmem:[%s1999_s2 + $0x10] sm:$0xff] }
 0x141   : > { %v788_v18 = vadd.f32 %v780_v5, %v756_v63  ;;  %1261 = vmatpush1.bf16.msra.mxu0 %v1260_v58 }
 0x142   : > { %v789_v15 = vadd.f32 %v780_v5, %v757_v41 }
 0x143   : > { %v796_v0 = vmax.f32 %v788_v18, 0.0  ;;  %v820_v18 = vpop.permute.xlu1 %819 }
 0x144   : > { %v797_v32 = vmax.f32 %v789_v15, 0.0 }
 0x145   : > { %v1264_v35 = vpack.c.bf16 %v796_v0, %v794_v22 }
 0x146   : > { %v1262_v42 = vpack.c.bf16 %v797_v32, %v795_v28 }
 0x148   : > { %1263 = vmatprep.subr.bf16.mxu0 %v1262_v42 }
 0x149   : > { %1265 = vmatpush1.bf16.msra.mxu0 %v1264_v35 }
 0x14c   : > { %1167 = vmatmul.mubr.msk.f32.vlgmr.msra.gmra.mrb[12].mxu0 %vm306_vm0, %v294_v31 }
 0x14d   : > { %904 = vmatprep.mubr.f32.mxu0 %v2013_v50 }
 0x150   : > { %1168 = vmatmul.mubr.msk.f32.gmra.mrb[14].mxu0 %vm306_vm0, %v295_v43 }
 0x151   : > { %910 = vmatprep.mubr.f32.mxu0 %v2013_v50 }
 0x154   : > { %1169 = vmatmul.mubr.msk.f32.gmra.mrb[16].mxu0 %vm306_vm0, %v296_v26 }
 0x155   : > { %916 = vmatprep.mubr.f32.mxu0 %v2013_v50 }
 0x158   : > { %1170 = vmatmul.mubr.msk.f32.gmra.mrb[18].mxu0 %vm306_vm0, %v297_v44 }
 0x21f   : > { %v900_v49 = vpop.f32.mrb[12].mxu0 }
 0x220   : > { %v901_v52 = vadd.f32 %v900_v49, %v805_v51  ;;  %v902_v40 = vpop.f32.mrb[13].mxu0 }
 0x221   : > { %v903_v10 = vadd.f32 %v902_v40, %v805_v51 }
 0x222   : > { %v923_v55 = vadd.f32 %v901_v52, %v1630_v4  ;;  %v947_v57 = vadd.f32 %v1662_v16, %v901_v52  ;;  %v972_v60 = vadd.f32 %v1676_v21, %v901_v52  ;;  %v997_v58 = vadd.f32 %v1754_v45, %v901_v52  ;;  %v815_v45 = vpop.permute.xlu0 %814 }
 0x223   : > { %v924_v61 = vadd.f32 %v903_v10, %v1624_v2  ;;  %v948_v62 = vadd.f32 %v1654_v13, %v903_v10  ;;  %v973_v27 = vadd.f32 %v1665_v17, %v903_v10  ;;  %v998_v9 = vadd.f32 %v1730_v38, %v903_v10  ;;  %v906_v59 = vpop.f32.mrb[14].mxu0 }
 0x224   : > { %931 = vst [vmem:[%s1883_s13] sm:$0xff] %v923_v55  ;;  %1179 = vst [vmem:[%s1883_s13 + $0x40] sm:$0xff] %v947_v57  ;;  %v907_v2 = vadd.f32 %v906_v59, %v810_v56  ;;  %v908_v4 = vpop.f32.mrb[15].mxu0 }
 0x225   : > { %1195 = vst [vmem:[%s1883_s13 + $0x80] sm:$0xff] %v972_v60  ;;  %1211 = vst [vmem:[%s1883_s13 + $0xc0] sm:$0xff] %v997_v58  ;;  %v909_v13 = vadd.f32 %v908_v4, %v810_v56 }
 0x226   : > { %932 = vst [vmem:[%s1883_s13 + $0x8] sm:$0xff] %v924_v61  ;;  %1180 = vst [vmem:[%s1883_s13 + $0x48] sm:$0xff] %v948_v62  ;;  %v925_v16 = vadd.f32 %v907_v2, %v1635_v6  ;;  %v949_v17 = vadd.f32 %v1670_v19, %v907_v2  ;;  %v974_v21 = vadd.f32 %v1681_v23, %v907_v2 }
 0x227   : > { %1196 = vst [vmem:[%s1883_s13 + $0x88] sm:$0xff] %v973_v27  ;;  %1212 = vst [vmem:[%s1883_s13 + $0xc8] sm:$0xff] %v998_v9  ;;  %v999_v38 = vadd.f32 %v1757_v46, %v907_v2  ;;  %v926_v63 = vadd.f32 %v909_v13, %v1627_v3  ;;  %v950_v5 = vadd.f32 %v1657_v14, %v909_v13  ;;  %v912_v6 = vpop.f32.mrb[16].mxu0 }
 0x228   : > { %v975_v1 = vadd.f32 %v1673_v20, %v909_v13  ;;  %v1000_v41 = vadd.f32 %v1733_v39, %v909_v13  ;;  %933 = vst [vmem:[%s1883_s13 + $0x10] sm:$0xff] %v925_v16  ;;  %1181 = vst [vmem:[%s1883_s13 + $0x50] sm:$0xff] %v949_v17  ;;  %v913_v19 = vadd.f32 %v912_v6, %v815_v45  ;;  %v914_v23 = vpop.f32.mrb[17].mxu0 }
 0x229   : > { %1197 = vst [vmem:[%s1883_s13 + $0x90] sm:$0xff] %v974_v21  ;;  %1213 = vst [vmem:[%s1883_s13 + $0xd0] sm:$0xff] %v999_v38  ;;  %v915_v3 = vadd.f32 %v914_v23, %v815_v45 }
 0x22a   : > { %934 = vst [vmem:[%s1883_s13 + $0x18] sm:$0xff] %v926_v63  ;;  %1182 = vst [vmem:[%s1883_s13 + $0x58] sm:$0xff] %v950_v5  ;;  %v927_v14 = vadd.f32 %v913_v19, %v1648_v11  ;;  %v951_v20 = vadd.f32 %v1712_v33, %v913_v19  ;;  %v976_v39 = vadd.f32 %v1720_v36, %v913_v19 }
 0x22b   : > { %1198 = vst [vmem:[%s1883_s13 + $0x98] sm:$0xff] %v975_v1  ;;  %1214 = vst [vmem:[%s1883_s13 + $0xd8] sm:$0xff] %v1000_v41  ;;  %v1001_v46 = vadd.f32 %v1782_v53, %v913_v19  ;;  %v928_v15 = vadd.f32 %v915_v3, %v1638_v7  ;;  %v952_v22 = vadd.f32 %v1684_v24, %v915_v3  ;;  %v918_v11 = vpop.f32.mrb[18].mxu0 }
 0x22c   : > { %v977_v0 = vadd.f32 %v1702_v29, %v915_v3  ;;  %v1002_v28 = vadd.f32 %v1764_v47, %v915_v3  ;;  %935 = vst [vmem:[%s1883_s13 + $0x20] sm:$0xff] %v927_v14  ;;  %1183 = vst [vmem:[%s1883_s13 + $0x60] sm:$0xff] %v951_v20  ;;  %v919_v33 = vadd.f32 %v918_v11, %v820_v18  ;;  %v920_v36 = vpop.f32.mrb[19].mxu0 }
 0x22d   : > { %1199 = vst [vmem:[%s1883_s13 + $0xa0] sm:$0xff] %v976_v39  ;;  %1215 = vst [vmem:[%s1883_s13 + $0xe0] sm:$0xff] %v1001_v46  ;;  %v921_v7 = vadd.f32 %v920_v36, %v820_v18 }
 0x22e   : > { %936 = vst [vmem:[%s1883_s13 + $0x28] sm:$0xff] %v928_v15  ;;  %1184 = vst [vmem:[%s1883_s13 + $0x68] sm:$0xff] %v952_v22  ;;  %v929_v24 = vadd.f32 %v919_v33, %v1651_v12  ;;  %v953_v29 = vadd.f32 %v1715_v34, %v919_v33  ;;  %v978_v47 = vadd.f32 %v1723_v37, %v919_v33 }
 0x22f   : > { %1200 = vst [vmem:[%s1883_s13 + $0xa8] sm:$0xff] %v977_v0  ;;  %1216 = vst [vmem:[%s1883_s13 + $0xe8] sm:$0xff] %v1002_v28  ;;  %v1003_v53 = vadd.f32 %v1785_v54, %v919_v33  ;;  %v930_v12 = vadd.f32 %v921_v7, %v1641_v8  ;;  %v954_v34 = vadd.f32 %v1687_v25, %v921_v7 }
 0x230   : > { %v979_v32 = vadd.f32 %v1705_v30, %v921_v7  ;;  %v1004_v37 = vadd.f32 %v1767_v48, %v921_v7  ;;  %937 = vst [vmem:[%s1883_s13 + $0x30] sm:$0xff] %v929_v24  ;;  %1185 = vst [vmem:[%s1883_s13 + $0x70] sm:$0xff] %v953_v29 }
 0x231   : > { %1201 = vst [vmem:[%s1883_s13 + $0xb0] sm:$0xff] %v978_v47  ;;  %1217 = vst [vmem:[%s1883_s13 + $0xf0] sm:$0xff] %v1003_v53 }
 0x232   : > { %938 = vst [vmem:[%s1883_s13 + $0x38] sm:$0xff] %v930_v12  ;;  %1186 = vst [vmem:[%s1883_s13 + $0x78] sm:$0xff] %v954_v34 }
 0x233   : > { %1202 = vst [vmem:[%s1883_s13 + $0xb8] sm:$0xff] %v979_v32  ;;  %1218 = vst [vmem:[%s1883_s13 + $0xf8] sm:$0xff] %v1004_v37 }
 0x234   : > { %1383 = shalt.err (!%p1380_p5)
}
 0x235   : > { %s1384_s20 = scalar_lea.hbm %s1934_s8, 4096  ;;  %s1388_s13 = scalar_lea.hbm %s2003_s6, 8192 }
 0x236   : > { %p1385_p4 = scmp.ne.s32.totalorder %s1934_s8, %s1384_s20  ;;  %p1389_p12 = scmp.lt.u32.totalorder %s1934_s8, %s2003_s6 }
 0x237   : > { %p1390_p1 = scmp.lt.u32.totalorder %s1388_s13, %s1384_s20  ;;  %p1392_p8 = scmp.lt.u32.totalorder %s1384_s20, %s1934_s8 }
 0x238   : > { %p1386_p7 = pnand %p1385_p4, %p2014_p9 }
 0x239   : > { %p1391_p3 = por %p1390_p1, %p1389_p12 }
 0x23a   : > { %p1387_p10 = pneg %p1386_p7 }
 0x23b   : > { %p1393_p11 = por %p1392_p8, %p1391_p3 }
 0x23d   : > { %p1394_p0 = pnand %p1393_p11, %p1387_p10 }
 0x23f   : > { %1397 = shalt.err (!%p1394_p0)
}
 0x240   : > { %s1460_s19 = smov 256   ;;  %s1461_s14 = smov 16  }
 0x241   : > { %1272 = dma.vmem_to_hbm [thread:$0]  (%p2014_p9), %s1936_s17, 4096, %s1934_s8, %s1015_s30, %s1460_s19, %s1460_s19, %s1461_s14  }
 0x242 PF: > { %s1045_s16 = sand.u32 1, %s1432_s21   ;;  %p2015_p6 = scmp.ne.s32.totalorder %s2010_s12, 0 }
 0x243   : > { %p2016_p13 = scmp.ge.s32.totalorder %s1452_s26, 2  ;;  %s1046_s9 = scalar_lea.sflag [#allocation4], %s1045_s16 }
 0x245   : > { %p1279_p2 = pnand %p2016_p13, %p2015_p6 }
 0x247   : > { %1427 = dma.done.wait (!%p1279_p2), %s1046_s9, 4096  }
 0x248   : > { %1429 = vsyncadd (!%p1279_p2), %s1046_s9, 4294963200  ;;  %s22_s26 = sadd.s32 1, %s1452_s26   ;;  %s2017_s21 = smov %s1436_s22 }
 0x249   : > { %p19_p5 = scmp.ge.s32.totalorder %s22_s26, 4   ;;  %s2018_s22 = smov %s1440_s23 }
 0x24a   : > { %s2019_s23 = smov %s1553_s11  ;;  %s2020_s24 = smov %s1448_s25 }
 0x24b   : > { %s2021_s25 = smov %s2023_s29  ;;  %21 = sbr.rel (!%p19_p5) target bundleno = 6 (0x6), region = 95 }
 0x252   :  { %1051 = vsyncpa [#allocation3], 1 }
 0x253   :  { %1053 = vsyncpa [#allocation3 + $0x1], 1 }
 0x254   :  { %1054 = vsyncpa [#allocation4], 1 }
 0x255   :  { %1056 = vsyncpa [#allocation4 + $0x1], 1 }

</bundles_post_ra>
